<compile_context>
chip_gen: v7x
topology: tpu7x:2x2x1
jax: 0.10.0
libtpu: 0.0.40
codegen_flags: <defaults>
</compile_context>

<pallas_src>
import functools

import jax
import jax.numpy as jnp
from jax import lax
from jax.experimental import pallas as pl
from jax.experimental.pallas import tpu as pltpu


def _cdiv(a, b):
    return -(-a // b)


def _round_up(x, m):
    return _cdiv(x, m) * m


def _balanced_tile(dim, tile_max, multiple):
    """Split `dim` into cdiv(dim, tile_max) near-equal blocks, rounded up to
    `multiple`.  Minimizes zero-padding waste vs. a fixed tile size."""
    nb = max(1, _cdiv(dim, tile_max))
    return _round_up(_cdiv(dim, nb), multiple)


@functools.lru_cache(maxsize=1)
def _tpu_tile_defaults():
    """Generation-aware (tm_max, tn_max, tk_max, vmem_cap_bytes).

    128 MiB-VMEM chips (v5e/v6e): 1024-square tiles (~512 flop/byte, past the
    v6e HBM ridge).  64 MiB chips (v7x) have a lower ridge (~310 flop/byte), so
    512-square tiles already saturate the MXU while leaving pipeline headroom.
    """
    vmem_cap = 64 << 20
    try:
        vmem_cap = int(pltpu.get_tpu_info().vmem_capacity_bytes)
    except Exception:
        pass
    if vmem_cap >= (100 << 20):        # v5e / v6e class (128 MiB VMEM)
        tm, tn, tk = 1024, 1024, 1024
    else:                              # v7x class (64 MiB VMEM) or unknown
        tm, tn, tk = 512, 512, 1024
    return tm, tn, tk, int(vmem_cap * 3 // 4)


# ----------------------------------------------------------------------------
# Kernels
# ----------------------------------------------------------------------------
def _linear_kernel_single_k(x_ref, w_ref, b_ref, o_ref):
    """Single K block: o = x @ w.T + b, no accumulator scratch, fully parallel."""
    x = x_ref[...].astype(jnp.bfloat16)          # on-tile cast (VPU, hidden by MXU)
    acc = lax.dot_general(x, w_ref[...], (((1,), (1,)), ((), ())),
                          preferred_element_type=jnp.float32)
    o_ref[...] = (acc + b_ref[...]).astype(o_ref.dtype)


def _linear_kernel_multi_k(x_ref, w_ref, b_ref, o_ref, acc_ref):
    """K-tiled reduction; bias folded into the accumulator init at k == 0."""
    k = pl.program_id(2)

    @pl.when(k == 0)
    def _():
        acc_ref[...] = jnp.broadcast_to(b_ref[...], acc_ref.shape)

    x = x_ref[...].astype(jnp.bfloat16)
    acc_ref[...] += lax.dot_general(x, w_ref[...], (((1,), (1,)), ((), ())),
                                    preferred_element_type=jnp.float32)

    @pl.when(k == pl.num_programs(2) - 1)
    def _():
        o_ref[...] = acc_ref[...].astype(o_ref.dtype)


# ----------------------------------------------------------------------------
# Fused linear callable (the thing Lambda wraps in the demo)
# ----------------------------------------------------------------------------
class FusedLinear:
    """y = x @ weight.T + bias with a Pallas TPU matmul on the hot path.

    Weight/bias preprocessing (bf16 cast + tile padding) is done once here, in
    the weight's native (O, K) layout -- no HBM transpose is ever materialized.
    Applies to every positional input (all inputs are flattened and
    concatenated along M so the weight streams through one pallas_call).
    """

    _SINGLE_K_MAX = 2048   # eliminate the K grid axis below this (padded) K

    def __init__(self, weight, bias, *, out_dtype=None, force_pallas=False,
                 buffers=None):
        weight = jnp.asarray(weight)
        bias = jnp.asarray(bias)
        assert weight.ndim == 2 and bias.shape == (weight.shape[0],)
        self.out_features = int(weight.shape[0])
        self.in_features = int(weight.shape[1])
        self.out_dtype = out_dtype          # None -> match input dtype
        self.force_pallas = force_pallas
        self.buffers = buffers              # e.g. 3 -> pl.Buffered(3) on x/w

        tm_max, tn_max, tk_max, vmem_cap = _tpu_tile_defaults()
        self._tm_max = tm_max
        self._vmem_cap = vmem_cap

        N, K = self.out_features, self.in_features
        self.tn = _balanced_tile(N, tn_max, 128)
        kp128 = _round_up(K, 128)
        self.single_k = kp128 <= self._SINGLE_K_MAX
        self.tk = kp128 if self.single_k else _balanced_tile(K, tk_max, 128)
        self.Np = _round_up(N, self.tn)
        self.Kp = _round_up(K, self.tk)

        # Hoisted, cached weight/bias preprocessing (runs once, not per call).
        w = weight.astype(jnp.bfloat16)
        if (self.Np, self.Kp) != (N, K):
            w = jnp.pad(w, ((0, self.Np - N), (0, self.Kp - K)))
        b = bias.astype(jnp.float32).reshape(1, -1)
        if self.Np != N:
            b = jnp.pad(b, ((0, 0), (0, self.Np - N)))
        self.w_padded = w                  # (Np, Kp) bf16, native (O, K) layout
        self.b_padded = b                  # (1, Np)  f32
        self.weight = weight               # originals kept for the tiny-XLA path
        self.bias = bias

    # ---- per-call Pallas matmul --------------------------------------------
    def _pallas_linear(self, x2d):
        M, K = x2d.shape
        N = self.out_features
        out_dtype = self.out_dtype or x2d.dtype
        out_itemsize = jnp.dtype(out_dtype).itemsize
        tn, tk, Np, Kp = self.tn, self.tk, self.Np, self.Kp
        n_blocks_n = Np // tn

        # Balanced M tile; then make sure the parallel grid axes have >= 2
        # blocks so megacore sharding (v7x) has something to split.
        tm = _balanced_tile(M, self._tm_max, 16)
        if n_blocks_n == 1 and _cdiv(M, tm) == 1 and M >= 256:
            tm = _round_up(_cdiv(M, 2), 16)
        Mp = _round_up(M, tm)

        # x is re-read once per N tile: pre-cast to bf16 only when that happens
        # more than once; otherwise stream f32 once and cast on-tile.
        if n_blocks_n > 1 and x2d.dtype != jnp.bfloat16:
            x2d = x2d.astype(jnp.bfloat16)
        if (Mp, Kp) != (M, K):
            x2d = jnp.pad(x2d, ((0, Mp - M), (0, Kp - K)))
        x_itemsize = jnp.dtype(x2d.dtype).itemsize

        pipe = {"pipeline_mode": pl.Buffered(self.buffers)} if self.buffers else {}

        if self.single_k:
            grid = (Mp // tm, Np // tn)
            in_specs = [
                pl.BlockSpec((tm, Kp), lambda i, j: (i, 0), **pipe),   # x
                pl.BlockSpec((tn, Kp), lambda i, j: (j, 0), **pipe),   # w (O,K)
                pl.BlockSpec((1, tn), lambda i, j: (0, j)),            # bias
            ]
            out_specs = pl.BlockSpec((tm, tn), lambda i, j: (i, j))
            scratch = []
            kernel = _linear_kernel_single_k
            semantics = ("parallel", "parallel")
            need = (2 * tm * Kp * x_itemsize + 2 * tn * Kp * 2
                    + 2 * tn * 4 + 2 * tm * tn * out_itemsize)
        else:
            grid = (Mp // tm, Np // tn, Kp // tk)
            in_specs = [
                pl.BlockSpec((tm, tk), lambda i, j, k: (i, k), **pipe),  # x
                pl.BlockSpec((tn, tk), lambda i, j, k: (j, k), **pipe),  # w (O,K)
                pl.BlockSpec((1, tn), lambda i, j, k: (0, j)),           # bias
            ]
            out_specs = pl.BlockSpec((tm, tn), lambda i, j, k: (i, j))
            scratch = [pltpu.VMEM((tm, tn), jnp.float32)]
            kernel = _linear_kernel_multi_k
            semantics = ("parallel", "parallel", "arbitrary")
            need = (2 * tm * tk * x_itemsize + 2 * tn * tk * 2
                    + 2 * tn * 4 + 2 * tm * tn * out_itemsize + tm * tn * 4)

        # Generation-aware VMEM limit (75% of physical capacity cap).
        vmem_limit = int(min(self._vmem_cap, max(2 * need, 32 << 20)))

        out = pl.pallas_call(
            kernel,
            out_shape=jax.ShapeDtypeStruct((Mp, Np), out_dtype),
            grid_spec=pltpu.PrefetchScalarGridSpec(
                num_scalar_prefetch=0,
                grid=grid,
                in_specs=in_specs,
                out_specs=out_specs,
                scratch_shapes=scratch,
            ),
            compiler_params=pltpu.CompilerParams(
                dimension_semantics=semantics,
                vmem_limit_bytes=vmem_limit),
        )(x2d, self.w_padded, self.b_padded)

        return out[:M, :N]

    # ---- forward ------------------------------------------------------------
    def __call__(self, *xs):
        K, O = self.in_features, self.out_features
        for x in xs:
            assert x.shape[-1] == K, (
                f"input last dim {x.shape[-1]} != in_features {K}")
        leads = [x.shape[:-1] for x in xs]
        flats = [x.reshape(-1, K) for x in xs]
        rows = [f.shape[0] for f in flats]
        x2d = flats[0] if len(flats) == 1 else jnp.concatenate(flats, axis=0)
        M = x2d.shape[0]

        # Tiny problems: launch + DMA fixed cost dominates -> plain XLA.
        if self.force_pallas or (2 * M * K * O >= (1 << 24)):
            y2d = self._pallas_linear(x2d)
        else:
            y2d = x2d @ self.weight.T.astype(x2d.dtype) + self.bias.astype(x2d.dtype)

        outs, off = [], 0
        for lead, r in zip(leads, rows):
            outs.append(y2d[off:off + r].reshape(*lead, O))
            off += r
        return outs[0] if len(outs) == 1 else tuple(outs)


# ----------------------------------------------------------------------------
# Lambda module (the actual spec)
# ----------------------------------------------------------------------------
class Lambda:
    """JAX/Pallas port of neural_toolkits Lambda.

    forward(*input) -> func(*input, **kwargs)
    """

    def __init__(self, func, **kwargs):
        assert callable(func), 'The provided function must be callable'
        self.func = func
        self.kwargs = kwargs

    def __call__(self, *inputs):
        return self.func(*inputs, **self.kwargs)

    def extra_repr(self):
        return '{}'.format(getattr(self.func, '__name__', repr(self.func)))


if __name__ == "__main__":
    # Small shapes; hidden/out chosen as 128 so the demo output is lane-dense.
    B, S, H, O = 2, 8, 128, 128

    key = jax.random.PRNGKey(0)
    k_x1, k_x2, k_w, k_b = jax.random.split(key, 4)

    x1 = jax.random.normal(k_x1, (B, S, H), dtype=jnp.float32)
    x2 = jax.random.normal(k_x2, (B, S, H), dtype=jnp.float32)
    weight = jax.random.normal(k_w, (O, H), dtype=jnp.float32) * 0.05
    bias = jax.random.normal(k_b, (O,), dtype=jnp.float32) * 0.01

    # Lambda wrapping the fused Pallas linear; force the Pallas path so the
    # kernel actually runs at demo sizes (the gate would pick XLA here).
    mod = Lambda(FusedLinear(weight, bias, force_pallas=True))
    outs = jax.block_until_ready(mod(x1, x2))

    # Reference (f32). bf16 operands in the kernel -> modest tolerance.
    ref = tuple(jnp.einsum("bsh,oh->bso", x, weight) + bias for x in (x1, x2))
    for o, r in zip(outs, ref):
        assert o.shape == (B, S, O)
        assert jnp.allclose(o, r, atol=2e-2, rtol=2e-2)

    # Lambda semantics with a plain callable + kwargs (docstring example).
    foo_sum = Lambda(lambda x, y: x + y, y=1.0)
    assert jnp.allclose(foo_sum(x1), x1 + 1.0)

    print("KERNEL_OK")
</pallas_src>

<mosaic_0001>
module attributes {stable_mosaic.version = 11 : i64} {
  func.func @_linear_kernel_single_k(%arg0: i32, %arg1: i32, %arg2: memref<32x128xf32, #tpu.memory_space<vmem>>, %arg3: memref<128x128xbf16, #tpu.memory_space<vmem>>, %arg4: memref<1x128xf32, #tpu.memory_space<vmem>>, %arg5: memref<32x128xf32, #tpu.memory_space<vmem>>) attributes {dimension_semantics = [#tpu.dimension_semantics<parallel>, #tpu.dimension_semantics<parallel>], iteration_bounds = array<i64: 1, 1>, scalar_prefetch = 0 : i64, scratch_operands = 0 : i64, tpu.core_type = #tpu.core_type<tc>, window_params = [{transform_indices = @transform_0, window_bounds = array<i64: 32, 128>}, {transform_indices = @transform_1, window_bounds = array<i64: 128, 128>}, {transform_indices = @transform_2, window_bounds = array<i64: 1, 128>}, {transform_indices = @transform_3, window_bounds = array<i64: 32, 128>}]} {
    %c0 = arith.constant 0 : index
    %c0_0 = arith.constant 0 : index
    %0 = vector.load %arg2[%c0, %c0_0] : memref<32x128xf32, #tpu.memory_space<vmem>>, vector<32x128xf32>
    %1 = arith.truncf %0 : vector<32x128xf32> to vector<32x128xbf16>
    %c0_1 = arith.constant 0 : index
    %c0_2 = arith.constant 0 : index
    %2 = vector.load %arg3[%c0_1, %c0_2] : memref<128x128xbf16, #tpu.memory_space<vmem>>, vector<128x128xbf16>
    %cst = arith.constant dense<0.000000e+00> : vector<32x128xf32>
    %3 = tpu.matmul %1, %2, %cst {dimension_numbers = #tpu.dot_dimension_numbers<[1], [1], [0], [0], [0, 0, 1, 0], [], []>} : vector<32x128xbf16>, vector<128x128xbf16>, vector<32x128xf32> -> vector<32x128xf32>
    %c0_3 = arith.constant 0 : index
    %c0_4 = arith.constant 0 : index
    %4 = vector.load %arg4[%c0_3, %c0_4] : memref<1x128xf32, #tpu.memory_space<vmem>>, vector<1x128xf32>
    %5 = vector.broadcast %4 : vector<1x128xf32> to vector<32x128xf32>
    %6 = arith.addf %3, %5 : vector<32x128xf32>
    %c0_5 = arith.constant 0 : index
    %c0_6 = arith.constant 0 : index
    %7 = vector.load %arg5[%c0_5, %c0_6] : memref<32x128xf32, #tpu.memory_space<vmem>>, vector<32x128xf32>
    tpu.vector_store %arg5[%c0_5, %c0_6], %6 {strides = array<i32>} : memref<32x128xf32, #tpu.memory_space<vmem>>, vector<32x128xf32>,
    return
  }
  func.func @transform_0(%arg0: i32, %arg1: i32) -> (i32, i32) {
    %c0_i32 = arith.constant 0 : i32
    %c0_i32_0 = arith.constant 0 : i32
    return %arg0, %c0_i32 : i32, i32
  }
  func.func @transform_1(%arg0: i32, %arg1: i32) -> (i32, i32) {
    %c0_i32 = arith.constant 0 : i32
    %c0_i32_0 = arith.constant 0 : i32
    return %arg1, %c0_i32 : i32, i32
  }
  func.func @transform_2(%arg0: i32, %arg1: i32) -> (i32, i32) {
    %c0_i32 = arith.constant 0 : i32
    %c0_i32_0 = arith.constant 0 : i32
    return %c0_i32, %arg1 : i32, i32
  }
  func.func @transform_3(%arg0: i32, %arg1: i32) -> (i32, i32) {
    %c0_i32 = arith.constant 0 : i32
    return %arg0, %arg1 : i32, i32
  }
}

</mosaic_0001>

<bundles_post_ra>
// kernel: tpu_custom_call.1
= control target key start
LH: loop header
LB: loop body
LE: loop exit
PB: predicated region body
PF: predicated region fallthrough
CT: control target
= control target key end

     0   :  { %8 = vsyncpa [#allocation3], 0  ;;  %s390_s0 = inlined_call_operand.hbm [shape: f32[32,128], index: 0, kind: input, shape index: {}]   ;;  %s391_s1 = inlined_call_operand.hbm [shape: bf16[128,128], index: 1, kind: input, shape index: {}]   ;;  %s392_s2 = inlined_call_operand.vmem [shape: f32[1,128], index: 2, kind: input, shape index: {}]   ;;  %s393_s3 = inlined_call_operand.hbm [shape: f32[32,128], index: 3, kind: output, shape index: {}]  }
   0x1   :  { %9 = vsyncpa [#allocation6], 0 }
   0x2   :  { %10 = vsyncpa [#allocation4], 0  ;;  %s318_s12 = smov [#allocation2]   ;;  %s246_s16 = scalar_lea.hbm %s390_s0, 512 }
   0x3   :  { %s16_s13 = sshll.u32 %s318_s12, 4  ;;  %p247_p0 = scmp.ne.s32.totalorder %s390_s0, %s246_s16  ;;  %s17_s13 = int_to_ptr.vmem [resolvable:$true] %s16_s13 }
   0x4   :  { %p250_p1 = scmp.lt.u32.totalorder %s246_s16, %s390_s0 }
   0x6   :  { %p252_p2 = pnand %p250_p1, %p247_p0 }
   0x8   :  { %255 = shalt.err (!%p252_p2)
}
   0x9   :  { %s256_s21 = scalar_lea.vmem %s17_s13, 512  ;;  %p261_p4 = scmp.lt.s32.totalorder %s17_s13, %s17_s13 }
   0xa   :  { %p257_p3 = scmp.ne.s32.totalorder %s17_s13, %s256_s21  ;;  %p262_p5 = scmp.lt.s32.totalorder %s256_s21, %s256_s21 }
   0xc   :  { %p263_p6 = por %p262_p5, %p261_p4 }
   0xe   :  { %p264_p7 = pnand %p263_p6, %p257_p3 }
  0x10   :  { %267 = shalt.err (!%p264_p7)
}
  0x11   :  { %s319_s22 = smov 128   ;;  %s320_s23 = smov 8  }
  0x12   :  { %22 = dma.hbm_to_vmem [thread:$0]  %s390_s0, 512, %s17_s13, [#allocation3], %s319_s22, %s319_s22, %s320_s23  }
  0x13   :  { %s321_s26 = smov [#allocation5]   ;;  %s268_s30 = scalar_lea.hbm %s391_s1, 1024 }
  0x14   :  { %s28_s27 = sshll.u32 %s321_s26, 4  ;;  %p269_p8 = scmp.ne.s32.totalorder %s391_s1, %s268_s30  ;;  %s29_s27 = int_to_ptr.vmem [resolvable:$true] %s28_s27 }
  0x15   :  { %p272_p9 = scmp.lt.u32.totalorder %s268_s30, %s391_s1 }
  0x17   :  { %p274_p10 = pnand %p272_p9, %p269_p8 }
  0x19   :  { %277 = shalt.err (!%p274_p10)
}
  0x1a   :  { %s278_s8 = scalar_lea.vmem %s29_s27, 1024  ;;  %p283_p12 = scmp.lt.s32.totalorder %s29_s27, %s29_s27 }
  0x1b   :  { %p279_p11 = scmp.ne.s32.totalorder %s29_s27, %s278_s8  ;;  %p284_p13 = scmp.lt.s32.totalorder %s278_s8, %s278_s8 }
  0x1d   :  { %p285_p0 = por %p284_p13, %p283_p12 }
  0x1f   :  { %p286_p1 = pnand %p285_p0, %p279_p11 }
  0x21   :  { %289 = shalt.err (!%p286_p1)
}
  0x22   :  { %s322_s0 = smov 64   ;;  %s323_s9 = smov 4  }
  0x23   :  { %34 = dma.hbm_to_vmem [thread:$0]  %s391_s1, 1024, %s29_s27, [#allocation6], %s322_s0, %s322_s0, %s323_s9  }
  0x24   :  { %312 = dma.done.wait [#allocation3], 512  }
  0x25   :  { %313 = vsyncadd [#allocation3], 4294966784 }
  0x26   :  { %314 = dma.done.wait [#allocation6], 1024  }
  0x27   :  { %315 = vsyncadd [#allocation6], 4294966272  ;;  %v238_v0 = vld [vmem:[#allocation5] sm:$0xff]   ;;  %v239_v1 = vld [vmem:[#allocation5 + $0x8] sm:$0xff]   ;;  %s324_s13 = smov [#allocation7]  }
  0x28   :  { %211 = vmatprep.subr.bf16.mxu0 %v238_v0  ;;  %v240_v2 = vld [vmem:[#allocation5 + $0x10] sm:$0xff]   ;;  %v44_v3 = vld [vmem:[#allocation2] sm:$0xff]  ;;  %v45_v4 = vld [vmem:[#allocation2 + $0x8] sm:$0xff]  ;;  %s179_s14 = sshll.u32 %s324_s13, 4  ;;  %s180_s14 = int_to_ptr.vmem [resolvable:$true] %s179_s14 }
  0x29   :  { %212 = vmatpush3.bf16.xpose.msra.mxu0 %v238_v0  ;;  %v48_v5 = vpack.c.bf16 %v45_v4, %v44_v3  ;;  %v241_v6 = vld [vmem:[#allocation5 + $0x18] sm:$0xff]   ;;  %v242_v7 = vld [vmem:[#allocation5 + $0x20] sm:$0xff]   ;;  %v243_v8 = vld [vmem:[#allocation5 + $0x28] sm:$0xff]   ;;  %s290_s15 = scalar_lea.vmem %s180_s14, 512  ;;  %p295_p3 = scmp.lt.s32.totalorder %s180_s14, %s180_s14 }
  0x2a   :  { %213 = vmatprep.subr.bf16.mxu0 %v239_v1  ;;  %v244_v9 = vld [vmem:[#allocation5 + $0x30] sm:$0xff]   ;;  %v245_v10 = vld [vmem:[#allocation5 + $0x38] sm:$0xff]   ;;  %v192_v14 = vld [vmem:[%s392_s2] ss:$0 sm:$0xff]  ;;  %p291_p2 = scmp.ne.s32.totalorder %s180_s14, %s290_s15  ;;  %p296_p4 = scmp.lt.s32.totalorder %s290_s15, %s290_s15 }
  0x2b   :  { %227 = vmatprep.mubr.bf16.mxu0 %v48_v5  ;;  %v46_v11 = vld [vmem:[#allocation2 + $0x10] sm:$0xff]  ;;  %v47_v12 = vld [vmem:[#allocation2 + $0x18] sm:$0xff] }
  0x2c   :  { %v49_v13 = vpack.c.bf16 %v47_v12, %v46_v11  ;;  %p297_p5 = por %p296_p4, %p295_p3 }
  0x2e   :  { %p298_p6 = pnand %p297_p5, %p291_p2 }
  0x31   :  { %214 = vmatpush3.bf16.xpose.msra.mxu0 %v239_v1 }
  0x32   :  { %215 = vmatprep.subr.bf16.mxu0 %v240_v2 }
  0x39   :  { %216 = vmatpush3.bf16.xpose.msra.mxu0 %v240_v2 }
  0x3a   :  { %217 = vmatprep.subr.bf16.mxu0 %v241_v6 }
  0x41   :  { %218 = vmatpush3.bf16.xpose.msra.mxu0 %v241_v6 }
  0x42   :  { %219 = vmatprep.subr.bf16.mxu0 %v242_v7 }
  0x49   :  { %220 = vmatpush3.bf16.xpose.msra.mxu0 %v242_v7 }
  0x4a   :  { %221 = vmatprep.subr.bf16.mxu0 %v243_v8 }
  0x51   :  { %222 = vmatpush3.bf16.xpose.msra.mxu0 %v243_v8 }
  0x52   :  { %223 = vmatprep.subr.bf16.mxu0 %v244_v9 }
  0x59   :  { %224 = vmatpush3.bf16.xpose.msra.mxu0 %v244_v9 }
  0x5a   :  { %225 = vmatprep.subr.bf16.mxu0 %v245_v10 }
  0x61   :  { %226 = vmatpush3.bf16.xpose.msra.mxu0 %v245_v10 }
  0x68   :  { %228 = vmatmul.mubr.bf16.vlgmr.msra.gmra.mrb[0].mxu0 %v49_v13 }
 0x13b   :  { %v229_v15 = vpop.f32.mrb[0].mxu0 }
 0x13c   :  { %v164_v16 = vadd.f32 %v229_v15, %v192_v14  ;;  %v155_v17 = vpop.f32.mrb[1].mxu0 }
 0x13d   :  { %v156_v18 = vadd.f32 %v192_v14, %v155_v17  ;;  %v230_v19 = vpop.f32.mrb[2].mxu0 }
 0x13e   :  { %172 = vst [vmem:[#allocation7 + $0x10] sm:$0xff] %v164_v16  ;;  %v167_v20 = vadd.f32 %v230_v19, %v192_v14  ;;  %v158_v21 = vpop.f32.mrb[3].mxu0 }
 0x13f   :  { %170 = vst [vmem:[#allocation7] sm:$0xff] %v156_v18  ;;  %v159_v22 = vadd.f32 %v192_v14, %v158_v21 }
 0x140   :  { %173 = vst [vmem:[#allocation7 + $0x18] sm:$0xff] %v167_v20 }
 0x141   :  { %171 = vst [vmem:[#allocation7 + $0x8] sm:$0xff] %v159_v22 }
 0x142   :  { %301 = shalt.err (!%p298_p6)
}
 0x143   :  { %s302_s17 = scalar_lea.hbm %s393_s3, 512 }
 0x144   :  { %p303_p7 = scmp.ne.s32.totalorder %s393_s3, %s302_s17  ;;  %p306_p8 = scmp.lt.u32.totalorder %s302_s17, %s393_s3 }
 0x146   :  { %p308_p9 = pnand %p306_p8, %p303_p7 }
 0x148   :  { %311 = shalt.err (!%p308_p9)
}
 0x149   :  { %185 = dma.vmem_to_hbm [thread:$0]  %s180_s14, 512, %s393_s3, [#allocation4], %s319_s22, %s319_s22, %s320_s23  }
 0x14a   :  { %316 = dma.done.wait [#allocation4], 512  }
 0x14b   :  { %317 = vsyncadd [#allocation4], 4294966784 }
 0x14c   :  { %189 = vsyncpa [#allocation3], 1 }
 0x14d   :  { %190 = vsyncpa [#allocation6], 1 }
 0x14e   :  { %191 = vsyncpa [#allocation4], 1 }

</bundles_post_ra>
